<compile_context>
chip_gen: v7x
topology: tpu7x:2x2x1
jax: 0.10.0
libtpu: 0.0.40
codegen_flags: <defaults>
</compile_context>

<pallas_src>
import jax
import jax.numpy as jnp
import numpy as np
from jax.experimental import pallas as pl
from jax.experimental.pallas import tpu as pltpu

NUM_LABELS = 30
OUT_PAD = 128  # fused classifier width: [0:2]=binary, [2:32]=label0, [32:62]=label1


def _rbert_head_kernel(seq_ref, pooled_ref, masks_ref, inv_len_ref,
                       w_cls_ref, b_cls_ref, w_ent_ref, b_ent_ref,
                       w_fused_ref, b_fused_ref, out_ref):
    seq = seq_ref[...]                       # [TB, S, H] native dtype (bf16)
    masks = masks_ref[...]                   # [TB, 4, S] same dtype as seq (0/1 exact)
    TB = masks.shape[0]
    H = seq.shape[-1]
    cdt = seq.dtype                          # MXU input dtype (bf16 by default)

    # ---- entity sums for all 4 masks in one batched MXU matmul (f32 acc) -----
    sums = jnp.einsum('bks,bsh->bkh', masks, seq,
                      preferred_element_type=jnp.float32)           # [TB, 4, H] f32
    # 1/length comes precomputed from the host ([TB,4,1]); broadcast along lanes.
    # TODO(synk): empty entity spans arrive as inf (divide-by-zero on host),
    # matching the PyTorch reference behavior.
    ent = sums * inv_len_ref[...]                                    # [TB, 4, H] f32

    e1 = ent[:, 0, :]
    e2 = ent[:, 1, :]
    e3 = ent[:, 2, :]
    e4 = ent[:, 3, :]

    # ---- FCLayer = dropout(identity at eval) -> tanh -> linear ---------------
    # TODO(synk): dropout(p=0.1) is a no-op in eval mode; not modeled.
    pooled = pooled_ref[...].astype(jnp.float32)                     # [TB, H] tiny
    cls_h = jnp.dot(jnp.tanh(pooled).astype(cdt), w_cls_ref[...],
                    preferred_element_type=jnp.float32) + b_cls_ref[...]

    # e1 / e2 share entity_fc_layer: stack along M for a single MXU push.
    e12 = jnp.tanh(jnp.concatenate([e1, e2], axis=0)).astype(cdt)    # [2*TB, H]
    ent_h = jnp.dot(e12, w_ent_ref[...],
                    preferred_element_type=jnp.float32) + b_ent_ref[...]

    # The classifier FCLayers apply tanh to concat_h first.  One long-K fused dot:
    # p = tanh(concat_h) in [TB, 5H] (lane-aligned when H % 128 == 0, e.g. H=768).
    p = jnp.concatenate([jnp.tanh(cls_h),
                         jnp.tanh(ent_h[:TB, :]),
                         jnp.tanh(ent_h[TB:, :]),
                         jnp.tanh(e3),
                         jnp.tanh(e4)], axis=-1).astype(cdt)         # [TB, 5H]

    fused = jnp.dot(p, w_fused_ref[...],
                    preferred_element_type=jnp.float32) + b_fused_ref[...]  # [TB,128]

    binary_logits = fused[:, 0:2]
    logits0 = fused[:, 2:2 + NUM_LABELS]
    logits1 = fused[:, 2 + NUM_LABELS:2 + 2 * NUM_LABELS]

    # torch.argmax(binary_logits, 1): class 1 only if strictly greater (ties -> 0)
    sel1 = fused[:, 1:2] > fused[:, 0:1]
    logits_sel = jnp.where(sel1, logits1, logits0)

    # single lane-dense [TB, 128] store: cols 0:2 = binary, 2:32 = routed logits
    pad = jnp.zeros((TB, OUT_PAD - 2 - NUM_LABELS), jnp.float32)
    out_ref[...] = jnp.concatenate([binary_logits, logits_sel, pad], axis=-1)


def prepare_head_params(params, compute_dtype=jnp.bfloat16):
    """Hoisted (call once): fuse the 3 skinny classifier heads into a 128-wide
    weight/bias and cast the big weights to the MXU compute dtype."""
    (w_cls, b_cls, w_ent, b_ent, w_bin, b_bin, w_l0, b_l0, w_l1, b_l1) = params
    H = w_cls.shape[0]

    w_fused = jnp.zeros((5 * H, OUT_PAD), jnp.float32)
    w_fused = w_fused.at[:, 0:2].set(w_bin)
    w_fused = w_fused.at[:, 2:2 + NUM_LABELS].set(w_l0)
    w_fused = w_fused.at[:, 2 + NUM_LABELS:2 + 2 * NUM_LABELS].set(w_l1)
    b_fused = jnp.zeros((1, OUT_PAD), jnp.float32)
    b_fused = b_fused.at[:, 0:2].set(b_bin)
    b_fused = b_fused.at[:, 2:2 + NUM_LABELS].set(b_l0)
    b_fused = b_fused.at[:, 2 + NUM_LABELS:2 + 2 * NUM_LABELS].set(b_l1)

    return (w_cls.astype(compute_dtype), b_cls.astype(jnp.float32),
            w_ent.astype(compute_dtype), b_ent.astype(jnp.float32),
            w_fused.astype(compute_dtype), b_fused.astype(jnp.float32))


def _pick_tile_b(B, requested):
    """Largest layout-friendly divisor of B that is <= requested (no padding,
    no partial blocks).  If B fits in one tile, use B."""
    requested = max(1, int(requested))
    if B <= requested:
        return B
    for d in range(requested, 0, -1):
        if B % d == 0 and d % 8 == 0:
            return d
    return B  # no multiple-of-8 divisor <= requested: fall back to a single block


def rbert_head(seq, pooled, masks, prepared, *, tile_b=32,
               vmem_limit_bytes=48 * 1024 * 1024, single_buffer_weights=True):
    """seq: [B,S,H]; pooled: [B,H]; masks: [B,4,S] stacked entity masks.
    prepared: output of prepare_head_params().

    Generation guidance (perf review):
      v5e/v6e: tile_b 32-64, vmem_limit_bytes ~64-96 MiB (128 MiB physical VMEM).
      v7x:     tile_b 16-32, keep vmem_limit_bytes <= ~48 MiB (64 MiB physical),
               and keep B/tile_b >= 2 so the 'parallel' axis uses both TensorCores.
    """
    B, S, H = seq.shape
    w_cls, b_cls, w_ent, b_ent, w_fused, b_fused = prepared
    cdt = w_cls.dtype

    # Stream the big operands in the compute dtype (bf16 by default): halves the
    # dominant HBM DMA.  No-op if they already arrive in that dtype.
    seq = seq.astype(cdt)
    masks_c = masks.astype(cdt)  # 0/1 values: exact in bf16

    # Host-side reciprocal entity lengths ([B,4,1]): hoists a cross-lane reduce
    # + divide out of the per-tile hot loop.
    lengths = jnp.sum((masks != 0).astype(jnp.float32), axis=2, keepdims=True)
    # TODO(synk): empty entity spans divide by zero (inf/NaN) as in the PyTorch ref.
    inv_len = 1.0 / lengths

    tile_b = _pick_tile_b(B, tile_b)
    n_blocks = B // tile_b

    const2 = lambda i: (0, 0)
    # Grid-invariant weights: single-buffer them (double-buffering constant blocks
    # is pure VMEM waste).
    wmode = pl.Buffered(1) if single_buffer_weights else None
    in_specs = [
        pl.BlockSpec((tile_b, S, H), lambda i: (i, 0, 0)),   # seq (pipelined over B)
        pl.BlockSpec((tile_b, H), lambda i: (i, 0)),         # pooled
        pl.BlockSpec((tile_b, 4, S), lambda i: (i, 0, 0)),   # stacked masks
        pl.BlockSpec((tile_b, 4, 1), lambda i: (i, 0, 0)),   # 1/length (host-precomputed)
        pl.BlockSpec((H, H), const2, pipeline_mode=wmode),       # w_cls (resident)
        pl.BlockSpec((1, H), const2, pipeline_mode=wmode),       # b_cls
        pl.BlockSpec((H, H), const2, pipeline_mode=wmode),       # w_ent
        pl.BlockSpec((1, H), const2, pipeline_mode=wmode),       # b_ent
        pl.BlockSpec((5 * H, OUT_PAD), const2, pipeline_mode=wmode),  # fused classifier W
        pl.BlockSpec((1, OUT_PAD), const2, pipeline_mode=wmode),      # fused classifier b
    ]

    out = pl.pallas_call(
        _rbert_head_kernel,
        out_shape=jax.ShapeDtypeStruct((B, OUT_PAD), jnp.float32),
        grid=(n_blocks,),
        in_specs=in_specs,
        out_specs=pl.BlockSpec((tile_b, OUT_PAD), lambda i: (i, 0)),
        compiler_params=pltpu.CompilerParams(
            dimension_semantics=("parallel",),   # shards the batch grid across TCs on v7x
            vmem_limit_bytes=vmem_limit_bytes,   # scoped defaults are only 16/32 MiB
        ),
    )(seq, pooled, masks_c, inv_len, w_cls, b_cls, w_ent, b_ent, w_fused, b_fused)

    binary_logits = out[:, 0:2]
    logits = out[:, 2:2 + NUM_LABELS]
    return binary_logits, logits


# ----------------------------- glue / reference -----------------------------

def init_params(key, H):
    ks = jax.random.split(key, 5)

    def lin(k, din, dout):
        kw, kb = jax.random.split(k)
        scale = 1.0 / np.sqrt(din)
        w = jax.random.uniform(kw, (din, dout), jnp.float32, -scale, scale)
        b = jax.random.uniform(kb, (1, dout), jnp.float32, -scale, scale)
        return w, b

    w_cls, b_cls = lin(ks[0], H, H)
    w_ent, b_ent = lin(ks[1], H, H)
    w_bin, b_bin = lin(ks[2], 5 * H, 2)
    w_l0, b_l0 = lin(ks[3], 5 * H, NUM_LABELS)
    w_l1, b_l1 = lin(ks[4], 5 * H, NUM_LABELS)
    return (w_cls, b_cls, w_ent, b_ent, w_bin, b_bin, w_l0, b_l0, w_l1, b_l1)


def stub_encoder(key, input_ids, attention_mask, H, vocab):
    # TODO(synk): pretrained AutoModel backbone has no Pallas equivalent; this
    # deterministic stub (embedding lookup + tanh pooler) stands in for it.
    k_emb, k_pool = jax.random.split(key)
    emb = jax.random.normal(k_emb, (vocab, H), jnp.float32) * 0.1
    seq = jnp.tanh(emb[input_ids]) * attention_mask[..., None].astype(jnp.float32)
    w_pool = jax.random.normal(k_pool, (H, H), jnp.float32) * 0.1
    pooled = jnp.tanh(seq[:, 0, :] @ w_pool)
    return seq, pooled


def reference_head(seq, pooled, masks, params):
    """Pure-JAX f32 reference.  Returns (binary_logits, logits_0, logits_1)."""
    (w_cls, b_cls, w_ent, b_ent, w_bin, b_bin, w_l0, b_l0, w_l1, b_l1) = params

    def ent_avg(m):
        s = jnp.einsum('bs,bsh->bh', m, seq)
        ln = jnp.sum((m != 0).astype(jnp.float32), axis=1, keepdims=True)
        return s / ln

    e1, e2, e3, e4 = (ent_avg(masks[:, k, :]) for k in range(4))
    fc = lambda x, w, b: jnp.tanh(x) @ w + b
    concat = jnp.concatenate([fc(pooled, w_cls, b_cls),
                              fc(e1, w_ent, b_ent),
                              fc(e2, w_ent, b_ent), e3, e4], axis=-1)
    return fc(concat, w_bin, b_bin), fc(concat, w_l0, b_l0), fc(concat, w_l1, b_l1)


if __name__ == "__main__":
    B, S, H, VOCAB = 2, 8, 32, 64
    key = jax.random.PRNGKey(0)
    k_ids, k_enc, k_par = jax.random.split(key, 3)

    input_ids = jax.random.randint(k_ids, (B, S), 0, VOCAB)
    attention_mask = jnp.ones((B, S), jnp.int32)

    # contiguous entity spans, e.g. [0,0,1,1,0,...]
    pos = jnp.arange(S)[None, :]
    e1_mask = ((pos >= 1) & (pos <= 2)).astype(jnp.float32) * jnp.ones((B, 1))
    e2_mask = ((pos >= 3) & (pos <= 4)).astype(jnp.float32) * jnp.ones((B, 1))
    e3_mask = ((pos >= 5) & (pos <= 5)).astype(jnp.float32) * jnp.ones((B, 1))
    e4_mask = ((pos >= 6) & (pos <= 7)).astype(jnp.float32) * jnp.ones((B, 1))
    masks = jnp.stack([e1_mask, e2_mask, e3_mask, e4_mask], axis=1)   # [B, 4, S]

    seq, pooled = stub_encoder(k_enc, input_ids, attention_mask, H, VOCAB)
    # Encoder output is streamed in bf16 (mixed-precision style), per perf review.
    seq = seq.astype(jnp.bfloat16)

    params = init_params(k_par, H)
    prepared = prepare_head_params(params, compute_dtype=jnp.bfloat16)

    try:
        binary_logits, logits = rbert_head(seq, pooled, masks, prepared)
    except Exception:
        # pl.Buffered(1) single-buffering may be unavailable on some jax versions;
        # fall back to default (double-buffered) weight specs.
        binary_logits, logits = rbert_head(seq, pooled, masks, prepared,
                                           single_buffer_weights=False)
    jax.block_until_ready((binary_logits, logits))

    # f32 reference from the same (bf16-valued) seq — isolates kernel rounding.
    seq_f32 = seq.astype(jnp.float32)
    ref_bl, ref_l0, ref_l1 = reference_head(seq_f32, pooled, masks, params)

    # 1) binary logits (routing-independent), bf16 tolerance.
    np.testing.assert_allclose(np.asarray(binary_logits), np.asarray(ref_bl),
                               rtol=2e-2, atol=2e-2)

    # 2) label logits, compared against the branch the kernel selected (avoids
    #    spurious mismatch if the binary decision is a near-tie under bf16).
    sel_k = np.argmax(np.asarray(binary_logits), axis=1)
    ref_routed = np.where(sel_k[:, None] == 1, np.asarray(ref_l1), np.asarray(ref_l0))
    np.testing.assert_allclose(np.asarray(logits), ref_routed, rtol=2e-2, atol=2e-2)

    # 3) routing agrees with the f32 reference whenever the margin is not a near-tie.
    ref_bl_np = np.asarray(ref_bl)
    sel_r = np.argmax(ref_bl_np, axis=1)
    margin = np.abs(ref_bl_np[:, 1] - ref_bl_np[:, 0])
    assert np.all((sel_k == sel_r) | (margin < 5e-2))

    assert logits.shape == (B, NUM_LABELS) and binary_logits.shape == (B, 2)
    print("KERNEL_OK")
</pallas_src>

<mosaic_0001>
module attributes {stable_mosaic.version = 11 : i64} {
  func.func @_rbert_head_kernel(%arg0: i32, %arg1: memref<2x8x32xbf16, #tpu.memory_space<vmem>>, %arg2: memref<2x32xf32, #tpu.memory_space<vmem>>, %arg3: memref<2x4x8xbf16, #tpu.memory_space<vmem>>, %arg4: memref<2x4x1xf32, #tpu.memory_space<vmem>>, %arg5: memref<32x32xbf16, #tpu.memory_space<vmem>>, %arg6: memref<1x32xf32, #tpu.memory_space<vmem>>, %arg7: memref<32x32xbf16, #tpu.memory_space<vmem>>, %arg8: memref<1x32xf32, #tpu.memory_space<vmem>>, %arg9: memref<160x128xbf16, #tpu.memory_space<vmem>>, %arg10: memref<1x128xf32, #tpu.memory_space<vmem>>, %arg11: memref<2x128xf32, #tpu.memory_space<vmem>>) attributes {dimension_semantics = [#tpu.dimension_semantics<parallel>], iteration_bounds = array<i64: 1>, scalar_prefetch = 0 : i64, scratch_operands = 0 : i64, tpu.core_type = #tpu.core_type<tc>, window_params = [{transform_indices = @transform_0, window_bounds = array<i64: 2, 8, 32>}, {transform_indices = @transform_1, window_bounds = array<i64: 2, 32>}, {transform_indices = @transform_2, window_bounds = array<i64: 2, 4, 8>}, {transform_indices = @transform_3, window_bounds = array<i64: 2, 4, 1>}, {pipeline_mode = #tpu.pipeline_mode<synchronous>, transform_indices = @transform_4, window_bounds = array<i64: 32, 32>}, {pipeline_mode = #tpu.pipeline_mode<synchronous>, transform_indices = @transform_5, window_bounds = array<i64: 1, 32>}, {pipeline_mode = #tpu.pipeline_mode<synchronous>, transform_indices = @transform_6, window_bounds = array<i64: 32, 32>}, {pipeline_mode = #tpu.pipeline_mode<synchronous>, transform_indices = @transform_7, window_bounds = array<i64: 1, 32>}, {pipeline_mode = #tpu.pipeline_mode<synchronous>, transform_indices = @transform_8, window_bounds = array<i64: 160, 128>}, {pipeline_mode = #tpu.pipeline_mode<synchronous>, transform_indices = @transform_9, window_bounds = array<i64: 1, 128>}, {transform_indices = @transform_10, window_bounds = array<i64: 2, 128>}]} {
    %c0 = arith.constant 0 : index
    %c0_0 = arith.constant 0 : index
    %c0_1 = arith.constant 0 : index
    %0 = vector.load %arg1[%c0, %c0_0, %c0_1] : memref<2x8x32xbf16, #tpu.memory_space<vmem>>, vector<2x8x32xbf16>
    %c0_2 = arith.constant 0 : index
    %c0_3 = arith.constant 0 : index
    %c0_4 = arith.constant 0 : index
    %1 = vector.load %arg3[%c0_2, %c0_3, %c0_4] : memref<2x4x8xbf16, #tpu.memory_space<vmem>>, vector<2x4x8xbf16>
    "tpu.trace_start"() <{level = 10 : i32, message = "bks,bsh->bkh"}> : () -> ()
    %cst = arith.constant dense<0.000000e+00> : vector<2x4x32xf32>
    %2 = tpu.matmul %1, %0, %cst {dimension_numbers = #tpu.dot_dimension_numbers<[2], [1], [1], [2], [0, 0, 0, 1, 1, 2], [0], [0]>} : vector<2x4x8xbf16>, vector<2x8x32xbf16>, vector<2x4x32xf32> -> vector<2x4x32xf32>
    "tpu.trace_stop"() : () -> ()
    %c0_5 = arith.constant 0 : index
    %c0_6 = arith.constant 0 : index
    %c0_7 = arith.constant 0 : index
    %3 = vector.load %arg4[%c0_5, %c0_6, %c0_7] : memref<2x4x1xf32, #tpu.memory_space<vmem>>, vector<2x4x1xf32>
    %4 = vector.broadcast %3 : vector<2x4x1xf32> to vector<2x4x32xf32>
    %5 = arith.mulf %2, %4 : vector<2x4x32xf32>
    %6 = vector.extract_strided_slice %5 {offsets = [0, 0, 0], sizes = [2, 1, 32], strides = [1, 1, 1]} : vector<2x4x32xf32> to vector<2x1x32xf32>
    %7 = vector.shape_cast %6 : vector<2x1x32xf32> to vector<2x32xf32>
    %8 = vector.extract_strided_slice %5 {offsets = [0, 1, 0], sizes = [2, 1, 32], strides = [1, 1, 1]} : vector<2x4x32xf32> to vector<2x1x32xf32>
    %9 = vector.shape_cast %8 : vector<2x1x32xf32> to vector<2x32xf32>
    %10 = vector.extract_strided_slice %5 {offsets = [0, 2, 0], sizes = [2, 1, 32], strides = [1, 1, 1]} : vector<2x4x32xf32> to vector<2x1x32xf32>
    %11 = vector.shape_cast %10 : vector<2x1x32xf32> to vector<2x32xf32>
    %12 = vector.extract_strided_slice %5 {offsets = [0, 3, 0], sizes = [2, 1, 32], strides = [1, 1, 1]} : vector<2x4x32xf32> to vector<2x1x32xf32>
    %13 = vector.shape_cast %12 : vector<2x1x32xf32> to vector<2x32xf32>
    %c0_8 = arith.constant 0 : index
    %c0_9 = arith.constant 0 : index
    %14 = vector.load %arg2[%c0_8, %c0_9] : memref<2x32xf32, #tpu.memory_space<vmem>>, vector<2x32xf32>
    %15 = math.tanh %14 : vector<2x32xf32>
    %16 = arith.truncf %15 : vector<2x32xf32> to vector<2x32xbf16>
    %c0_10 = arith.constant 0 : index
    %c0_11 = arith.constant 0 : index
    %17 = vector.load %arg5[%c0_10, %c0_11] : memref<32x32xbf16, #tpu.memory_space<vmem>>, vector<32x32xbf16>
    %cst_12 = arith.constant dense<0.000000e+00> : vector<2x32xf32>
    %18 = tpu.matmul %16, %17, %cst_12 {dimension_numbers = #tpu.dot_dimension_numbers<[1], [0], [0], [1], [0, 0, 1, 1], [], []>} : vector<2x32xbf16>, vector<32x32xbf16>, vector<2x32xf32> -> vector<2x32xf32>
    %c0_13 = arith.constant 0 : index
    %c0_14 = arith.constant 0 : index
    %19 = vector.load %arg6[%c0_13, %c0_14] : memref<1x32xf32, #tpu.memory_space<vmem>>, vector<1x32xf32>
    %20 = vector.broadcast %19 : vector<1x32xf32> to vector<2x32xf32>
    %21 = arith.addf %18, %20 : vector<2x32xf32>
    %22 = tpu.concatenate %7, %9 in 0 : vector<2x32xf32>, vector<2x32xf32> -> vector<4x32xf32>
    %23 = math.tanh %22 : vector<4x32xf32>
    %24 = arith.truncf %23 : vector<4x32xf32> to vector<4x32xbf16>
    %c0_15 = arith.constant 0 : index
    %c0_16 = arith.constant 0 : index
    %25 = vector.load %arg7[%c0_15, %c0_16] : memref<32x32xbf16, #tpu.memory_space<vmem>>, vector<32x32xbf16>
    %cst_17 = arith.constant dense<0.000000e+00> : vector<4x32xf32>
    %26 = tpu.matmul %24, %25, %cst_17 {dimension_numbers = #tpu.dot_dimension_numbers<[1], [0], [0], [1], [0, 0, 1, 1], [], []>} : vector<4x32xbf16>, vector<32x32xbf16>, vector<4x32xf32> -> vector<4x32xf32>
    %c0_18 = arith.constant 0 : index
    %c0_19 = arith.constant 0 : index
    %27 = vector.load %arg8[%c0_18, %c0_19] : memref<1x32xf32, #tpu.memory_space<vmem>>, vector<1x32xf32>
    %28 = vector.broadcast %27 : vector<1x32xf32> to vector<4x32xf32>
    %29 = arith.addf %26, %28 : vector<4x32xf32>
    %30 = math.tanh %21 : vector<2x32xf32>
    %31 = vector.extract_strided_slice %29 {offsets = [0, 0], sizes = [2, 32], strides = [1, 1]} : vector<4x32xf32> to vector<2x32xf32>
    %32 = math.tanh %31 : vector<2x32xf32>
    %33 = vector.extract_strided_slice %29 {offsets = [2, 0], sizes = [2, 32], strides = [1, 1]} : vector<4x32xf32> to vector<2x32xf32>
    %34 = math.tanh %33 : vector<2x32xf32>
    %35 = math.tanh %11 : vector<2x32xf32>
    %36 = math.tanh %13 : vector<2x32xf32>
    %37 = tpu.concatenate %30, %32, %34, %35, %36 in 1 : vector<2x32xf32>, vector<2x32xf32>, vector<2x32xf32>, vector<2x32xf32>, vector<2x32xf32> -> vector<2x160xf32>
    %38 = arith.truncf %37 : vector<2x160xf32> to vector<2x160xbf16>
    %c0_20 = arith.constant 0 : index
    %c0_21 = arith.constant 0 : index
    %39 = vector.load %arg9[%c0_20, %c0_21] : memref<160x128xbf16, #tpu.memory_space<vmem>>, vector<160x128xbf16>
    %cst_22 = arith.constant dense<0.000000e+00> : vector<2x128xf32>
    %40 = tpu.matmul %38, %39, %cst_22 {dimension_numbers = #tpu.dot_dimension_numbers<[1], [0], [0], [1], [0, 0, 1, 1], [], []>} : vector<2x160xbf16>, vector<160x128xbf16>, vector<2x128xf32> -> vector<2x128xf32>
    %c0_23 = arith.constant 0 : index
    %c0_24 = arith.constant 0 : index
    %41 = vector.load %arg10[%c0_23, %c0_24] : memref<1x128xf32, #tpu.memory_space<vmem>>, vector<1x128xf32>
    %42 = vector.broadcast %41 : vector<1x128xf32> to vector<2x128xf32>
    %43 = arith.addf %40, %42 : vector<2x128xf32>
    %44 = vector.extract_strided_slice %43 {offsets = [0, 0], sizes = [2, 2], strides = [1, 1]} : vector<2x128xf32> to vector<2x2xf32>
    %45 = vector.extract_strided_slice %43 {offsets = [0, 2], sizes = [2, 30], strides = [1, 1]} : vector<2x128xf32> to vector<2x30xf32>
    %46 = vector.extract_strided_slice %43 {offsets = [0, 32], sizes = [2, 30], strides = [1, 1]} : vector<2x128xf32> to vector<2x30xf32>
    %47 = vector.extract_strided_slice %43 {offsets = [0, 1], sizes = [2, 1], strides = [1, 1]} : vector<2x128xf32> to vector<2x1xf32>
    %48 = vector.extract_strided_slice %43 {offsets = [0, 0], sizes = [2, 1], strides = [1, 1]} : vector<2x128xf32> to vector<2x1xf32>
    %49 = arith.cmpf ogt, %47, %48 : vector<2x1xf32>
    %50 = vector.shape_cast %49 : vector<2x1xi1> to vector<2x1xi1>
    %51 = vector.broadcast %50 : vector<2x1xi1> to vector<2x30xi1>
    %52 = arith.select %51, %46, %45 : vector<2x30xi1>, vector<2x30xf32>
    %cst_25 = arith.constant 0.000000e+00 : f32
    %53 = vector.broadcast %cst_25 : f32 to vector<2x96xf32>
    %54 = tpu.concatenate %44, %52, %53 in 1 : vector<2x2xf32>, vector<2x30xf32>, vector<2x96xf32> -> vector<2x128xf32>
    %c0_26 = arith.constant 0 : index
    %c0_27 = arith.constant 0 : index
    %55 = vector.load %arg11[%c0_26, %c0_27] : memref<2x128xf32, #tpu.memory_space<vmem>>, vector<2x128xf32>
    tpu.vector_store %arg11[%c0_26, %c0_27], %54 {strides = array<i32>} : memref<2x128xf32, #tpu.memory_space<vmem>>, vector<2x128xf32>,
    return
  }
  func.func @transform_0(%arg0: i32) -> (i32, i32, i32) {
    %c0_i32 = arith.constant 0 : i32
    %c0_i32_0 = arith.constant 0 : i32
    %c0_i32_1 = arith.constant 0 : i32
    return %arg0, %c0_i32, %c0_i32_0 : i32, i32, i32
  }
  func.func @transform_1(%arg0: i32) -> (i32, i32) {
    %c0_i32 = arith.constant 0 : i32
    %c0_i32_0 = arith.constant 0 : i32
    return %arg0, %c0_i32 : i32, i32
  }
  func.func @transform_2(%arg0: i32) -> (i32, i32, i32) {
    %c0_i32 = arith.constant 0 : i32
    %c0_i32_0 = arith.constant 0 : i32
    %c0_i32_1 = arith.constant 0 : i32
    return %arg0, %c0_i32, %c0_i32_0 : i32, i32, i32
  }
  func.func @transform_3(%arg0: i32) -> (i32, i32, i32) {
    %c0_i32 = arith.constant 0 : i32
    %c0_i32_0 = arith.constant 0 : i32
    %c0_i32_1 = arith.constant 0 : i32
    return %arg0, %c0_i32, %c0_i32_0 : i32, i32, i32
  }
  func.func @transform_4(%arg0: i32) -> (i32, i32) {
    %c0_i32 = arith.constant 0 : i32
    %c0_i32_0 = arith.constant 0 : i32
    %c0_i32_1 = arith.constant 0 : i32
    return %c0_i32, %c0_i32_0 : i32, i32
  }
  func.func @transform_5(%arg0: i32) -> (i32, i32) {
    %c0_i32 = arith.constant 0 : i32
    %c0_i32_0 = arith.constant 0 : i32
    %c0_i32_1 = arith.constant 0 : i32
    return %c0_i32, %c0_i32_0 : i32, i32
  }
  func.func @transform_6(%arg0: i32) -> (i32, i32) {
    %c0_i32 = arith.constant 0 : i32
    %c0_i32_0 = arith.constant 0 : i32
    %c0_i32_1 = arith.constant 0 : i32
    return %c0_i32, %c0_i32_0 : i32, i32
  }
  func.func @transform_7(%arg0: i32) -> (i32, i32) {
    %c0_i32 = arith.constant 0 : i32
    %c0_i32_0 = arith.constant 0 : i32
    %c0_i32_1 = arith.constant 0 : i32
    return %c0_i32, %c0_i32_0 : i32, i32
  }
  func.func @transform_8(%arg0: i32) -> (i32, i32) {
    %c0_i32 = arith.constant 0 : i32
    %c0_i32_0 = arith.constant 0 : i32
    %c0_i32_1 = arith.constant 0 : i32
    return %c0_i32, %c0_i32_0 : i32, i32
  }
  func.func @transform_9(%arg0: i32) -> (i32, i32) {
    %c0_i32 = arith.constant 0 : i32
    %c0_i32_0 = arith.constant 0 : i32
    %c0_i32_1 = arith.constant 0 : i32
    return %c0_i32, %c0_i32_0 : i32, i32
  }
  func.func @transform_10(%arg0: i32) -> (i32, i32) {
    %c0_i32 = arith.constant 0 : i32
    %c0_i32_0 = arith.constant 0 : i32
    return %arg0, %c0_i32 : i32, i32
  }
}

module attributes {stable_mosaic.version = 11 : i64} {
  func.func @_rbert_head_kernel(%arg0: i32, %arg1: memref<2x8x32xbf16, #tpu.memory_space<vmem>>, %arg2: memref<2x32xf32, #tpu.memory_space<vmem>>, %arg3: memref<2x4x8xbf16, #tpu.memory_space<vmem>>, %arg4: memref<2x4x1xf32, #tpu.memory_space<vmem>>, %arg5: memref<32x32xbf16, #tpu.memory_space<vmem>>, %arg6: memref<1x32xf32, #tpu.memory_space<vmem>>, %arg7: memref<32x32xbf16, #tpu.memory_space<vmem>>, %arg8: memref<1x32xf32, #tpu.memory_space<vmem>>, %arg9: memref<160x128xbf16, #tpu.memory_space<vmem>>, %arg10: memref<1x128xf32, #tpu.memory_space<vmem>>, %arg11: memref<2x128xf32, #tpu.memory_space<vmem>>) attributes {dimension_semantics = [#tpu.dimension_semantics<parallel>], iteration_bounds = array<i64: 1>, scalar_prefetch = 0 : i64, scratch_operands = 0 : i64, tpu.core_type = #tpu.core_type<tc>, window_params = [{transform_indices = @transform_0, window_bounds = array<i64: 2, 8, 32>}, {transform_indices = @transform_1, window_bounds = array<i64: 2, 32>}, {transform_indices = @transform_2, window_bounds = array<i64: 2, 4, 8>}, {transform_indices = @transform_3, window_bounds = array<i64: 2, 4, 1>}, {pipeline_mode = #tpu.pipeline_mode<synchronous>, transform_indices = @transform_4, window_bounds = array<i64: 32, 32>}, {pipeline_mode = #tpu.pipeline_mode<synchronous>, transform_indices = @transform_5, window_bounds = array<i64: 1, 32>}, {pipeline_mode = #tpu.pipeline_mode<synchronous>, transform_indices = @transform_6, window_bounds = array<i64: 32, 32>}, {pipeline_mode = #tpu.pipeline_mode<synchronous>, transform_indices = @transform_7, window_bounds = array<i64: 1, 32>}, {pipeline_mode = #tpu.pipeline_mode<synchronous>, transform_indices = @transform_8, window_bounds = array<i64: 160, 128>}, {pipeline_mode = #tpu.pipeline_mode<synchronous>, transform_indices = @transform_9, window_bounds = array<i64: 1, 128>}, {transform_indices = @transform_10, window_bounds = array<i64: 2, 128>}]} {
    %c0 = arith.constant 0 : index
    %c0_0 = arith.constant 0 : index
    %c0_1 = arith.constant 0 : index
    %0 = vector.load %arg1[%c0, %c0_0, %c0_1] : memref<2x8x32xbf16, #tpu.memory_space<vmem>>, vector<2x8x32xbf16>
    %c0_2 = arith.constant 0 : index
    %c0_3 = arith.constant 0 : index
    %c0_4 = arith.constant 0 : index
    %1 = vector.load %arg3[%c0_2, %c0_3, %c0_4] : memref<2x4x8xbf16, #tpu.memory_space<vmem>>, vector<2x4x8xbf16>
    "tpu.trace_start"() <{level = 10 : i32, message = "bks,bsh->bkh"}> : () -> ()
    %cst = arith.constant dense<0.000000e+00> : vector<2x4x32xf32>
    %2 = tpu.matmul %1, %0, %cst {dimension_numbers = #tpu.dot_dimension_numbers<[2], [1], [1], [2], [0, 0, 0, 1, 1, 2], [0], [0]>} : vector<2x4x8xbf16>, vector<2x8x32xbf16>, vector<2x4x32xf32> -> vector<2x4x32xf32>
    "tpu.trace_stop"() : () -> ()
    %c0_5 = arith.constant 0 : index
    %c0_6 = arith.constant 0 : index
    %c0_7 = arith.constant 0 : index
    %3 = vector.load %arg4[%c0_5, %c0_6, %c0_7] : memref<2x4x1xf32, #tpu.memory_space<vmem>>, vector<2x4x1xf32>
    %4 = vector.broadcast %3 : vector<2x4x1xf32> to vector<2x4x32xf32>
    %5 = arith.mulf %2, %4 : vector<2x4x32xf32>
    %6 = vector.extract_strided_slice %5 {offsets = [0, 0, 0], sizes = [2, 1, 32], strides = [1, 1, 1]} : vector<2x4x32xf32> to vector<2x1x32xf32>
    %7 = vector.shape_cast %6 : vector<2x1x32xf32> to vector<2x32xf32>
    %8 = vector.extract_strided_slice %5 {offsets = [0, 1, 0], sizes = [2, 1, 32], strides = [1, 1, 1]} : vector<2x4x32xf32> to vector<2x1x32xf32>
    %9 = vector.shape_cast %8 : vector<2x1x32xf32> to vector<2x32xf32>
    %10 = vector.extract_strided_slice %5 {offsets = [0, 2, 0], sizes = [2, 1, 32], strides = [1, 1, 1]} : vector<2x4x32xf32> to vector<2x1x32xf32>
    %11 = vector.shape_cast %10 : vector<2x1x32xf32> to vector<2x32xf32>
    %12 = vector.extract_strided_slice %5 {offsets = [0, 3, 0], sizes = [2, 1, 32], strides = [1, 1, 1]} : vector<2x4x32xf32> to vector<2x1x32xf32>
    %13 = vector.shape_cast %12 : vector<2x1x32xf32> to vector<2x32xf32>
    %c0_8 = arith.constant 0 : index
    %c0_9 = arith.constant 0 : index
    %14 = vector.load %arg2[%c0_8, %c0_9] : memref<2x32xf32, #tpu.memory_space<vmem>>, vector<2x32xf32>
    %15 = math.tanh %14 : vector<2x32xf32>
    %16 = arith.truncf %15 : vector<2x32xf32> to vector<2x32xbf16>
    %c0_10 = arith.constant 0 : index
    %c0_11 = arith.constant 0 : index
    %17 = vector.load %arg5[%c0_10, %c0_11] : memref<32x32xbf16, #tpu.memory_space<vmem>>, vector<32x32xbf16>
    %cst_12 = arith.constant dense<0.000000e+00> : vector<2x32xf32>
    %18 = tpu.matmul %16, %17, %cst_12 {dimension_numbers = #tpu.dot_dimension_numbers<[1], [0], [0], [1], [0, 0, 1, 1], [], []>} : vector<2x32xbf16>, vector<32x32xbf16>, vector<2x32xf32> -> vector<2x32xf32>
    %c0_13 = arith.constant 0 : index
    %c0_14 = arith.constant 0 : index
    %19 = vector.load %arg6[%c0_13, %c0_14] : memref<1x32xf32, #tpu.memory_space<vmem>>, vector<1x32xf32>
    %20 = vector.broadcast %19 : vector<1x32xf32> to vector<2x32xf32>
    %21 = arith.addf %18, %20 : vector<2x32xf32>
    %22 = tpu.concatenate %7, %9 in 0 : vector<2x32xf32>, vector<2x32xf32> -> vector<4x32xf32>
    %23 = math.tanh %22 : vector<4x32xf32>
    %24 = arith.truncf %23 : vector<4x32xf32> to vector<4x32xbf16>
    %c0_15 = arith.constant 0 : index
    %c0_16 = arith.constant 0 : index
    %25 = vector.load %arg7[%c0_15, %c0_16] : memref<32x32xbf16, #tpu.memory_space<vmem>>, vector<32x32xbf16>
    %cst_17 = arith.constant dense<0.000000e+00> : vector<4x32xf32>
    %26 = tpu.matmul %24, %25, %cst_17 {dimension_numbers = #tpu.dot_dimension_numbers<[1], [0], [0], [1], [0, 0, 1, 1], [], []>} : vector<4x32xbf16>, vector<32x32xbf16>, vector<4x32xf32> -> vector<4x32xf32>
    %c0_18 = arith.constant 0 : index
    %c0_19 = arith.constant 0 : index
    %27 = vector.load %arg8[%c0_18, %c0_19] : memref<1x32xf32, #tpu.memory_space<vmem>>, vector<1x32xf32>
    %28 = vector.broadcast %27 : vector<1x32xf32> to vector<4x32xf32>
    %29 = arith.addf %26, %28 : vector<4x32xf32>
    %30 = math.tanh %21 : vector<2x32xf32>
    %31 = vector.extract_strided_slice %29 {offsets = [0, 0], sizes = [2, 32], strides = [1, 1]} : vector<4x32xf32> to vector<2x32xf32>
    %32 = math.tanh %31 : vector<2x32xf32>
    %33 = vector.extract_strided_slice %29 {offsets = [2, 0], sizes = [2, 32], strides = [1, 1]} : vector<4x32xf32> to vector<2x32xf32>
    %34 = math.tanh %33 : vector<2x32xf32>
    %35 = math.tanh %11 : vector<2x32xf32>
    %36 = math.tanh %13 : vector<2x32xf32>
    %37 = tpu.concatenate %30, %32, %34, %35, %36 in 1 : vector<2x32xf32>, vector<2x32xf32>, vector<2x32xf32>, vector<2x32xf32>, vector<2x32xf32> -> vector<2x160xf32>
    %38 = arith.truncf %37 : vector<2x160xf32> to vector<2x160xbf16>
    %c0_20 = arith.constant 0 : index
    %c0_21 = arith.constant 0 : index
    %39 = vector.load %arg9[%c0_20, %c0_21] : memref<160x128xbf16, #tpu.memory_space<vmem>>, vector<160x128xbf16>
    %cst_22 = arith.constant dense<0.000000e+00> : vector<2x128xf32>
    %40 = tpu.matmul %38, %39, %cst_22 {dimension_numbers = #tpu.dot_dimension_numbers<[1], [0], [0], [1], [0, 0, 1, 1], [], []>} : vector<2x160xbf16>, vector<160x128xbf16>, vector<2x128xf32> -> vector<2x128xf32>
    %c0_23 = arith.constant 0 : index
    %c0_24 = arith.constant 0 : index
    %41 = vector.load %arg10[%c0_23, %c0_24] : memref<1x128xf32, #tpu.memory_space<vmem>>, vector<1x128xf32>
    %42 = vector.broadcast %41 : vector<1x128xf32> to vector<2x128xf32>
    %43 = arith.addf %40, %42 : vector<2x128xf32>
    %44 = vector.extract_strided_slice %43 {offsets = [0, 0], sizes = [2, 2], strides = [1, 1]} : vector<2x128xf32> to vector<2x2xf32>
    %45 = vector.extract_strided_slice %43 {offsets = [0, 2], sizes = [2, 30], strides = [1, 1]} : vector<2x128xf32> to vector<2x30xf32>
    %46 = vector.extract_strided_slice %43 {offsets = [0, 32], sizes = [2, 30], strides = [1, 1]} : vector<2x128xf32> to vector<2x30xf32>
    %47 = vector.extract_strided_slice %43 {offsets = [0, 1], sizes = [2, 1], strides = [1, 1]} : vector<2x128xf32> to vector<2x1xf32>
    %48 = vector.extract_strided_slice %43 {offsets = [0, 0], sizes = [2, 1], strides = [1, 1]} : vector<2x128xf32> to vector<2x1xf32>
    %49 = arith.cmpf ogt, %47, %48 : vector<2x1xf32>
    %50 = vector.shape_cast %49 : vector<2x1xi1> to vector<2x1xi1>
    %51 = vector.broadcast %50 : vector<2x1xi1> to vector<2x30xi1>
    %52 = arith.select %51, %46, %45 : vector<2x30xi1>, vector<2x30xf32>
    %cst_25 = arith.constant 0.000000e+00 : f32
    %53 = vector.broadcast %cst_25 : f32 to vector<2x96xf32>
    %54 = tpu.concatenate %44, %52, %53 in 1 : vector<2x2xf32>, vector<2x30xf32>, vector<2x96xf32> -> vector<2x128xf32>
    %c0_26 = arith.constant 0 : index
    %c0_27 = arith.constant 0 : index
    %55 = vector.load %arg11[%c0_26, %c0_27] : memref<2x128xf32, #tpu.memory_space<vmem>>, vector<2x128xf32>
    tpu.vector_store %arg11[%c0_26, %c0_27], %54 {strides = array<i32>} : memref<2x128xf32, #tpu.memory_space<vmem>>, vector<2x128xf32>,
    return
  }
  func.func @transform_0(%arg0: i32) -> (i32, i32, i32) {
    %c0_i32 = arith.constant 0 : i32
    %c0_i32_0 = arith.constant 0 : i32
    %c0_i32_1 = arith.constant 0 : i32
    return %arg0, %c0_i32, %c0_i32_0 : i32, i32, i32
  }
  func.func @transform_1(%arg0: i32) -> (i32, i32) {
    %c0_i32 = arith.constant 0 : i32
    %c0_i32_0 = arith.constant 0 : i32
    return %arg0, %c0_i32 : i32, i32
  }
  func.func @transform_2(%arg0: i32) -> (i32, i32, i32) {
    %c0_i32 = arith.constant 0 : i32
    %c0_i32_0 = arith.constant 0 : i32
    %c0_i32_1 = arith.constant 0 : i32
    return %arg0, %c0_i32, %c0_i32_0 : i32, i32, i32
  }
  func.func @transform_3(%arg0: i32) -> (i32, i32, i32) {
    %c0_i32 = arith.constant 0 : i32
    %c0_i32_0 = arith.constant 0 : i32
    %c0_i32_1 = arith.constant 0 : i32
    return %arg0, %c0_i32, %c0_i32_0 : i32, i32, i32
  }
  func.func @transform_4(%arg0: i32) -> (i32, i32) {
    %c0_i32 = arith.constant 0 : i32
    %c0_i32_0 = arith.constant 0 : i32
    %c0_i32_1 = arith.constant 0 : i32
    return %c0_i32, %c0_i32_0 : i32, i32
  }
  func.func @transform_5(%arg0: i32) -> (i32, i32) {
    %c0_i32 = arith.constant 0 : i32
    %c0_i32_0 = arith.constant 0 : i32
    %c0_i32_1 = arith.constant 0 : i32
    return %c0_i32, %c0_i32_0 : i32, i32
  }
  func.func @transform_6(%arg0: i32) -> (i32, i32) {
    %c0_i32 = arith.constant 0 : i32
    %c0_i32_0 = arith.constant 0 : i32
    %c0_i32_1 = arith.constant 0 : i32
    return %c0_i32, %c0_i32_0 : i32, i32
  }
  func.func @transform_7(%arg0: i32) -> (i32, i32) {
    %c0_i32 = arith.constant 0 : i32
    %c0_i32_0 = arith.constant 0 : i32
    %c0_i32_1 = arith.constant 0 : i32
    return %c0_i32, %c0_i32_0 : i32, i32
  }
  func.func @transform_8(%arg0: i32) -> (i32, i32) {
    %c0_i32 = arith.constant 0 : i32
    %c0_i32_0 = arith.constant 0 : i32
    %c0_i32_1 = arith.constant 0 : i32
    return %c0_i32, %c0_i32_0 : i32, i32
  }
  func.func @transform_9(%arg0: i32) -> (i32, i32) {
    %c0_i32 = arith.constant 0 : i32
    %c0_i32_0 = arith.constant 0 : i32
    %c0_i32_1 = arith.constant 0 : i32
    return %c0_i32, %c0_i32_0 : i32, i32
  }
  func.func @transform_10(%arg0: i32) -> (i32, i32) {
    %c0_i32 = arith.constant 0 : i32
    %c0_i32_0 = arith.constant 0 : i32
    return %arg0, %c0_i32 : i32, i32
  }
}

</mosaic_0001>

<bundles_post_ra>
// kernel: tpu_custom_call.1
= control target key start
LH: loop header
LB: loop body
LE: loop exit
PB: predicated region body
PF: predicated region fallthrough
CT: control target
= control target key end

     0   :  { %15 = vsyncpa [#allocation3], 0  ;;  %s1013_s0 = inlined_call_operand.hbm [shape: bf16[2,8,32], index: 0, kind: input, shape index: {}]   ;;  %s1014_s1 = inlined_call_operand.hbm [shape: f32[2,32], index: 1, kind: input, shape index: {}]   ;;  %s1015_s2 = inlined_call_operand.hbm [shape: bf16[2,4,8], index: 2, kind: input, shape index: {}]   ;;  %s1016_s3 = inlined_call_operand.vmem [shape: f32[2,4,1], index: 3, kind: input, shape index: {}]   ;;  %s1017_s4 = inlined_call_operand.vmem [shape: bf16[32,32], index: 4, kind: input, shape index: {}]   ;;  %s1018_s5 = inlined_call_operand.hbm [shape: f32[1,32], index: 5, kind: input, shape index: {}]   ;;  %s1019_s6 = inlined_call_operand.vmem [shape: bf16[32,32], index: 6, kind: input, shape index: {}]   ;;  %s1020_s7 = inlined_call_operand.vmem [shape: f32[1,32], index: 7, kind: input, shape index: {}]   ;;  %s1021_s8 = inlined_call_operand.hbm [shape: bf16[160,128], index: 8, kind: input, shape index: {}]   ;;  %s1022_s9 = inlined_call_operand.vmem [shape: f32[1,128], index: 9, kind: input, shape index: {}]   ;;  %s1023_s10 = inlined_call_operand.hbm [shape: f32[2,128], index: 10, kind: output, shape index: {}]  }
   0x1   :  { %16 = vsyncpa [#allocation6], 0 }
   0x2   :  { %17 = vsyncpa [#allocation9], 0 }
   0x3   :  { %18 = vsyncpa [#allocation4], 0  ;;  %s810_s13 = smov [#allocation5]   ;;  %s811_s15 = smov [#allocation8]  }
   0x4   :  { %s37_s14 = sshll.u32 %s810_s13, 4  ;;  %s63_s16 = sshll.u32 %s811_s15, 4  ;;  %s38_s14 = int_to_ptr.vmem [resolvable:$true] %s37_s14  ;;  %s64_s16 = int_to_ptr.vmem [resolvable:$true] %s63_s16 }
   0x5   :  { %s670_s19 = scalar_lea.hbm %s1014_s1, 32 }
   0x6   :  { %p671_p0 = scmp.ne.s32.totalorder %s1014_s1, %s670_s19  ;;  %p674_p1 = scmp.lt.u32.totalorder %s670_s19, %s1014_s1 }
   0x8   :  { %p676_p2 = pnand %p674_p1, %p671_p0 }
   0xa   :  { %679 = shalt.err (!%p676_p2)
}
   0xb   :  { %s680_s24 = scalar_lea.vmem %s38_s14, 32  ;;  %p685_p4 = scmp.lt.s32.totalorder %s38_s14, %s38_s14 }
   0xc   :  { %p681_p3 = scmp.ne.s32.totalorder %s38_s14, %s680_s24  ;;  %p686_p5 = scmp.lt.s32.totalorder %s680_s24, %s680_s24 }
   0xe   :  { %p687_p6 = por %p686_p5, %p685_p4 }
  0x10   :  { %p688_p7 = pnand %p687_p6, %p681_p3 }
  0x12   :  { %691 = shalt.err (!%p688_p7)
}
  0x13   :  { %40 = dma.hbm_to_vmem [thread:$0]  %s1014_s1, 32, %s38_s14, [#allocation6]  }
  0x14   :  { %s692_s29 = scalar_lea.hbm %s1018_s5, 16 }
  0x15   :  { %p693_p8 = scmp.ne.s32.totalorder %s1018_s5, %s692_s29  ;;  %p696_p9 = scmp.lt.u32.totalorder %s692_s29, %s1018_s5 }
  0x17   :  { %p698_p10 = pnand %p696_p9, %p693_p8 }
  0x19   :  { %701 = shalt.err (!%p698_p10)
}
  0x1a   :  { %s702_s15 = scalar_lea.vmem %s64_s16, 16  ;;  %s706_s17 = scalar_lea.vmem %s64_s16, 32 }
  0x1b   :  { %p703_p11 = scmp.ne.s32.totalorder %s64_s16, %s702_s15  ;;  %p707_p12 = scmp.lt.s32.totalorder %s64_s16, %s64_s16 }
  0x1c   :  { %p708_p13 = scmp.lt.s32.totalorder %s706_s17, %s702_s15 }
  0x1e   :  { %p709_p0 = por %p708_p13, %p707_p12 }
  0x20   :  { %p710_p1 = pnand %p709_p0, %p703_p11 }
  0x22   :  { %713 = shalt.err (!%p710_p1)
}
  0x23   :  { %66 = dma.hbm_to_vmem [thread:$0]  %s1018_s5, 16, %s64_s16, [#allocation9]  }
  0x24   :  { %s812_s18 = smov [#allocation2]   ;;  %s714_s22 = scalar_lea.hbm %s1013_s0, 128 }
  0x25   :  { %s24_s19 = sshll.u32 %s812_s18, 4  ;;  %p715_p2 = scmp.ne.s32.totalorder %s1013_s0, %s714_s22  ;;  %s25_s19 = int_to_ptr.vmem [resolvable:$true] %s24_s19 }
  0x26   :  { %p718_p3 = scmp.lt.u32.totalorder %s714_s22, %s1013_s0 }
  0x28   :  { %p720_p4 = pnand %p718_p3, %p715_p2 }
  0x2a   :  { %723 = shalt.err (!%p720_p4)
}
  0x2b   :  { %s724_s27 = scalar_lea.vmem %s25_s19, 128  ;;  %p729_p6 = scmp.lt.s32.totalorder %s25_s19, %s25_s19 }
  0x2c   :  { %p725_p5 = scmp.ne.s32.totalorder %s25_s19, %s724_s27  ;;  %p730_p7 = scmp.lt.s32.totalorder %s724_s27, %s724_s27 }
  0x2e   :  { %p731_p8 = por %p730_p7, %p729_p6 }
  0x30   :  { %p732_p9 = pnand %p731_p8, %p725_p5 }
  0x32   :  { %735 = shalt.err (!%p732_p9)
}
  0x33   :  { %s813_s5 = smov 64   ;;  %s814_s16 = smov 4  }
  0x34   :  { %30 = dma.hbm_to_vmem [thread:$0]  %s1013_s0, 128, %s25_s19, [#allocation3], %s813_s5, %s813_s5, %s814_s16  }
  0x35   :  { %s815_s30 = smov [#allocation7]   ;;  %s736_s15 = scalar_lea.hbm %s1015_s2, 64 }
  0x36   :  { %s46_s11 = sshll.u32 %s815_s30, 4  ;;  %p737_p10 = scmp.ne.s32.totalorder %s1015_s2, %s736_s15  ;;  %s47_s11 = int_to_ptr.vmem [resolvable:$true] %s46_s11 }
  0x37   :  { %p740_p11 = scmp.lt.u32.totalorder %s736_s15, %s1015_s2 }
  0x39   :  { %p742_p12 = pnand %p740_p11, %p737_p10 }
  0x3b   :  { %745 = shalt.err (!%p742_p12)
}
  0x3c   :  { %s746_s20 = scalar_lea.vmem %s47_s11, 64  ;;  %p751_p0 = scmp.lt.s32.totalorder %s47_s11, %s47_s11 }
  0x3d   :  { %p747_p13 = scmp.ne.s32.totalorder %s47_s11, %s746_s20  ;;  %p752_p1 = scmp.lt.s32.totalorder %s746_s20, %s746_s20 }
  0x3f   :  { %p753_p2 = por %p752_p1, %p751_p0 }
  0x41   :  { %p754_p3 = pnand %p753_p2, %p747_p13 }
  0x43   :  { %757 = shalt.err (!%p754_p3)
}
  0x44   :  { %s816_s0 = smov 32   ;;  %s817_s19 = smov 2  }
  0x45   :  { %52 = dma.hbm_to_vmem [thread:$0]  %s1015_s2, 64, %s47_s11, [#allocation6], %s816_s0, %s816_s0, %s817_s19  }
  0x46   :  { %s818_s23 = smov [#allocation10]   ;;  %s758_s27 = scalar_lea.hbm %s1021_s8, 1280 }
  0x47   :  { %s76_s24 = sshll.u32 %s818_s23, 4  ;;  %p759_p4 = scmp.ne.s32.totalorder %s1021_s8, %s758_s27  ;;  %s77_s24 = int_to_ptr.vmem [resolvable:$true] %s76_s24 }
  0x48   :  { %p762_p5 = scmp.lt.u32.totalorder %s758_s27, %s1021_s8 }
  0x4a   :  { %p764_p6 = pnand %p762_p5, %p759_p4 }
  0x4c   :  { %767 = shalt.err (!%p764_p6)
}
  0x4d   :  { %s768_s13 = scalar_lea.vmem %s77_s24, 1280  ;;  %p773_p8 = scmp.lt.s32.totalorder %s77_s24, %s77_s24 }
  0x4e   :  { %p769_p7 = scmp.ne.s32.totalorder %s77_s24, %s768_s13  ;;  %p774_p9 = scmp.lt.s32.totalorder %s768_s13, %s768_s13 }
  0x50   :  { %p775_p10 = por %p774_p9, %p773_p8 }
  0x52   :  { %p776_p11 = pnand %p775_p10, %p769_p7 }
  0x54   :  { %779 = shalt.err (!%p776_p11)
}
  0x55   :  { %82 = dma.hbm_to_vmem [thread:$0]  %s1021_s8, 1280, %s77_s24, [#allocation9], %s813_s5, %s813_s5, %s814_s16  }
  0x56   :  { %802 = dma.done.wait [#allocation3], 128  }
  0x57   :  { %803 = vsyncadd [#allocation3], 4294967168 }
  0x58   :  { %804 = dma.done.wait [#allocation6], 96  }
  0x59   :  { %805 = vsyncadd [#allocation6], 4294967200 }
  0x5a   :  { %806 = dma.done.wait [#allocation9], 1296  }
  0x5b   :  { %807 = vsyncadd [#allocation9], 4294966000  ;;  %v819_v0 = vmov 0.0   ;;  %vm820_vm0 = vmmov 0   ;;  %v821_v1 = vmov 0   ;;  %vm109_vm1 = vcmask 1043456  }
  0x5c   :  { %596 = vmatprep.subr.bf16.mxu1 %v819_v0  ;;  %598 = vmatprep.mubr.msk.bf16.mxu1 %vm820_vm0, %v819_v0  ;;  %v101_v2 = vld [vmem:[#allocation2] sm:$0xf]  ;;  %v102_v3 = vld [vmem:[#allocation2 + $0x4] sm:$0xf]  ;;  %vm105_vm2 = vcmask 64512   ;;  %v645_v12 = vld [vmem:[%s1017_s4 + $0x8] sm:$0xff]  }
  0x5d   :  { %642 = vset.pattern.permute.xlu0 %v821_v1  ;;  %485 = vmatprep.subr.bf16.mxu0 %v821_v1  ;;  %v111_v4 = vsel %vm109_vm1, %v101_v2, 0  ;;  %v157_v5 = vsel %vm109_vm1, %v102_v3, 0  ;;  %v103_v6 = vld [vmem:[#allocation7] sm:$0x3]  ;;  %v199_v7 = vld [vmem:[%s1016_s3] sm:$0xf] }
  0x5e   :  { %597 = vmatpush3.bf16.msra.mxu1 %v111_v4  ;;  %203 = vperm.xlu0 %642, %v199_v7   ;;  %v200_v8 = vld [vmem:[%s1016_s3 + $0x4] sm:$0xf]  ;;  %v104_v9 = vld [vmem:[#allocation7 + $0x2] sm:$0x3]  ;;  %v213_v10 = vld [vmem:[#allocation5] sm:$0x3] }
  0x5f   :  { %602 = vmatprep.subr.bf16.mxu1 %v819_v0  ;;  %658 = vtanh.f32 %v213_v10  ;;  %v644_v11 = vld [vmem:[%s1017_s4] sm:$0xff]   ;;  %vm239_vm3 = vcmask 261120   ;;  %v647_v16 = vld [vmem:[%s1019_s6 + $0x8] sm:$0xff]   ;;  %vm291_vm4 = vcmask 1043459   ;;  %vm286_vm5 = vcmask 1041409   ;;  %s822_s4 = smov 96  }
  0x60   :  { %v646_v14 = vld [vmem:[%s1019_s6] sm:$0xff]   ;;  %vm294_vm6 = vcmask 1041408   ;;  %v648_v50 = vld [vmem:[#allocation10] sm:$0xff]   ;;  %v649_v51 = vld [vmem:[#allocation10 + $0x8] sm:$0xff]   ;;  %vm389_vm7 = vcmask 523264   ;;  %vm391_vm8 = vcmask 785408  }
  0x61   :  { %599 = vmatmul.mubr.msk.bf16.vlgmr.msra.gmra.mrb[0].mxu1 %vm105_vm2, %v103_v6  ;;  %486 = vmatpush1.bf16.msra.mxu0 %v648_v50  ;;  %v650_v52 = vld [vmem:[#allocation10 + $0x10] sm:$0xff]   ;;  %v651_v53 = vld [vmem:[#allocation10 + $0x18] sm:$0xff]   ;;  %v652_v54 = vld [vmem:[#allocation10 + $0x20] sm:$0xff]   ;;  %s825_s24 = smov 30   ;;  %s826_s25 = smov 98   ;;  %vm543_vm11 = vcmask 15360  }
  0x62   :  { %603 = vmatpush3.bf16.msra.mxu1 %v157_v5  ;;  %604 = vmatprep.mubr.msk.bf16.mxu1 %vm820_vm0, %v819_v0  ;;  %v653_v55 = vld [vmem:[#allocation10 + $0x28] sm:$0xff]   ;;  %v654_v56 = vld [vmem:[#allocation10 + $0x30] sm:$0xff]   ;;  %v655_v57 = vld [vmem:[#allocation10 + $0x38] sm:$0xff]  }
  0x63   :  { %208 = vperm.xlu0 %642, %v200_v8   ;;  %608 = vmatprep.subr.bf16.mxu1 %v819_v0  ;;  %v570_v58 = vld [vmem:[%s1020_s7] ss:$0 sm:$0xff]  ;;  %v656_v60 = vld [vmem:[#allocation10 + $0x40] sm:$0xff]   ;;  %v657_v2 = vld [vmem:[#allocation10 + $0x48] sm:$0xff]  }
  0x64   :  { %487 = vmatprep.subr.bf16.mxu0 %v821_v1  ;;  %v566_v5 = vld [vmem:[#allocation8] ss:$0 sm:$0xff] }
  0x65   :  { %488 = vmatpush1.bf16.msra.mxu0 %v649_v51 }
  0x66   :  { %489 = vmatprep.subr.bf16.mxu0 %v821_v1 }
  0x69   :  { %605 = vmatmul.mubr.msk.bf16.vlgmr.msra.gmra.mrb[4].mxu1 %vm105_vm2, %v104_v9  ;;  %v659_v13 = vpop.eup %658  ;;  %490 = vmatpush1.bf16.msra.mxu0 %v650_v52 }
  0x6a   :  { %612 = vmatprep.mubr.msk.bf16.mxu1 %vm820_vm0, %v819_v0  ;;  %609 = vmatpush3.bf16.msra.mxu1 %v644_v11  ;;  %v215_v15 = vpack.c.bf16 %v659_v13, %v659_v13 }
  0x6b   :  { %610 = vmatprep.subr.bf16.mxu1 %v819_v0  ;;  %491 = vmatprep.subr.bf16.mxu0 %v821_v1 }
  0x6d   :  { %492 = vmatpush1.bf16.msra.mxu0 %v651_v53 }
  0x6e   :  { %611 = vmatpush3.bf16.msra.mxu1 %v645_v12  ;;  %493 = vmatprep.subr.bf16.mxu0 %v821_v1 }
  0x6f   :  { %616 = vmatprep.subr.bf16.mxu1 %v819_v0 }
  0x71   :  { %613 = vmatmul.mubr.msk.bf16.vlgmr.msra.gmra.mrb[8].mxu1 %vm239_vm3, %v215_v15  ;;  %494 = vmatpush1.bf16.msra.mxu0 %v652_v54  ;;  %v823_v15 = vmov 1  }
  0x72   :  { %617 = vmatpush3.bf16.msra.mxu1 %v646_v14  ;;  %620 = vmatprep.mubr.msk.bf16.mxu1 %vm820_vm0, %v819_v0 }
  0x73   :  { %618 = vmatprep.subr.bf16.mxu1 %v819_v0  ;;  %495 = vmatprep.subr.bf16.mxu0 %v821_v1 }
  0x74   :  { %643 = vset.pattern.permute.xlu0 %v823_v15 }
  0x75   :  { %496 = vmatpush1.bf16.msra.mxu0 %v653_v55 }
  0x76   :  { %619 = vmatpush3.bf16.msra.mxu1 %v647_v16  ;;  %497 = vmatprep.subr.bf16.mxu0 %v821_v1  ;;  %v574_v16 = vld [vmem:[%s1022_s9] ss:$0 sm:$0xff]  ;;  %s827_s9 = smov [#allocation11]  }
  0x77   :  { %s553_s26 = sshll.u32 %s827_s9, 4  ;;  %s554_s26 = int_to_ptr.vmem [resolvable:$true] %s553_s26 }
  0x78   :  { %s780_s27 = scalar_lea.vmem %s554_s26, 32  ;;  %p785_p13 = scmp.lt.s32.totalorder %s554_s26, %s554_s26 }
  0x79   :  { %498 = vmatpush1.bf16.msra.mxu0 %v654_v56  ;;  %p781_p12 = scmp.ne.s32.totalorder %s554_s26, %s780_s27  ;;  %p786_p0 = scmp.lt.s32.totalorder %s780_s27, %s780_s27 }
  0x7a   :  { %499 = vmatprep.subr.bf16.mxu0 %v821_v1 }
  0x7b   :  { %p787_p1 = por %p786_p0, %p785_p13 }
  0x7d   :  { %500 = vmatpush1.bf16.msra.mxu0 %v655_v57  ;;  %p788_p2 = pnand %p787_p1, %p781_p12 }
  0x7e   :  { %501 = vmatprep.subr.bf16.mxu0 %v821_v1 }
  0x81   :  { %502 = vmatpush1.bf16.msra.mxu0 %v656_v60 }
  0x82   :  { %503 = vmatprep.subr.bf16.mxu0 %v821_v1 }
  0x85   :  { %504 = vmatpush1.bf16.msra.mxu0 %v657_v2 }
  0xdd   :  { %v204_v19 = vpop.permute.xlu0 %203 }
  0xe2   :  { %v209_v23 = vpop.permute.xlu0 %208 }
 0x134   :  { %v147_v17 = vpop.f32.mrb[0].mxu1 }
 0x135   :  { %v600_v18 = vpop.f32.mrb[1].mxu1  ;;  %v211_v22 = vmul.f32 %v204_v19, %v147_v17 }
 0x136   :  { %v150_v20 = vpop.f32.mrb[2].mxu1 }
 0x137   :  { %v601_v21 = vpop.f32.mrb[3].mxu1  ;;  %660 = vtanh.f32 %v211_v22  ;;  %v289_v28 = vrot.slane %v211_v22, 7 }
 0x13c   :  { %v193_v24 = vpop.f32.mrb[4].mxu1 }
 0x13d   :  { %v212_v25 = vmul.f32 %v209_v23, %v193_v24  ;;  %v606_v26 = vpop.f32.mrb[5].mxu1 }
 0x13e   :  { %v196_v27 = vpop.f32.mrb[6].mxu1 }
 0x13f   :  { %v285_v29 = vrot.slane %v212_v25, 7  ;;  %v290_v30 = vrot.slane %v212_v25, 6  ;;  %662 = vtanh.f32 %v212_v25  ;;  %v607_v31 = vpop.f32.mrb[7].mxu1 }
 0x141   :  { %v292_v32 = vsel %vm291_vm4, %v290_v30, %v289_v28  ;;  %v287_v33 = vsel %vm286_vm5, %v285_v29, %v211_v22  ;;  %v661_v35 = vpop.eup %660 }
 0x142   :  { %v295_v34 = vsel %vm294_vm6, %v287_v33, %v292_v32  ;;  %v378_v37 = vrot.slane %v661_v35, 2  ;;  %v384_v39 = vrot.slane %v661_v35, 3 }
 0x143   :  { %664 = vtanh.f32 %v295_v34 }
 0x144   :  { %v277_v46 = vpop.f32.mrb[8].mxu1 }
 0x145   :  { %v614_v47 = vpop.f32.mrb[9].mxu1  ;;  %v278_v6 = vadd.f32 %v566_v5, %v277_v46 }
 0x146   :  { %v280_v48 = vpop.f32.mrb[10].mxu1 }
 0x147   :  { %v615_v49 = vpop.f32.mrb[11].mxu1 }
 0x149   :  { %v663_v36 = vpop.eup %662 }
 0x14a   :  { %v379_v38 = vrot.slane %v663_v36, 1  ;;  %v385_v40 = vrot.slane %v663_v36, 2 }
 0x14c   :  { %v380_v41 = vsel %vm286_vm5, %v379_v38, %v378_v37  ;;  %v386_v42 = vsel %vm286_vm5, %v385_v40, %v384_v39 }
 0x14d   :  { %v665_v43 = vpop.eup %664  ;;  %381 = vrot.lane.b32.xlu0 %v380_v41, %s822_s4  ;;  %v394_v44 = vpack.c.bf16 %v386_v42, %v386_v42 }
 0x14e   :  { %v297_v45 = vpack.c.bf16 %v665_v43, %v665_v43 }
 0x14f   :  { %585 = vmatprep.mubr.msk.bf16.mxu0 %vm239_vm3, %v394_v44 }
 0x150   :  { %621 = vmatmul.mubr.msk.bf16.vlgmr.msra.gmra.mrb[12].mxu1 %vm239_vm3, %v297_v45 }
 0x1bf   :  { %v382_v11 = vpop.permute.xlu0 %381 }
 0x223   :  { %v358_v59 = vpop.f32.mrb[12].mxu1 }
 0x224   :  { %v359_v61 = vadd.f32 %v570_v58, %v358_v59  ;;  %v622_v62 = vpop.f32.mrb[13].mxu1 }
 0x225   :  { %v361_v63 = vpop.f32.mrb[14].mxu1 }
 0x226   :  { %666 = vtanh.f32 %v359_v61  ;;  %v623_v0 = vpop.f32.mrb[15].mxu1 }
 0x227   :  { %668 = vtanh.f32 %v278_v6 }
 0x230   :  { %v667_v3 = vpop.eup %666 }
 0x231   :  { %369 = vrot.lane.b32.xlu1 %v667_v3, %s816_s0  ;;  %v372_v4 = vrot.slane %v667_v3, 2  ;;  %v669_v8 = vpop.eup %668 }
 0x235   :  { %373 = vrot.lane.b32.xlu1 %v372_v4, %s813_s5  ;;  %s824_s5 = smov 1  }
 0x2a3   :  { %v370_v7 = vpop.permute.xlu1 %369 }
 0x2a4   :  { %v388_v9 = vsel %vm239_vm3, %v669_v8, %v370_v7 }
 0x2a7   :  { %v374_v10 = vpop.permute.xlu1 %373 }
 0x2a8   :  { %v390_v12 = vsel %vm389_vm7, %v388_v9, %v374_v10 }
 0x2a9   :  { %v392_v13 = vsel %vm391_vm8, %v390_v12, %v382_v11 }
 0x2aa   :  { %v393_v14 = vpack.c.bf16 %v392_v13, %v392_v13 }
 0x2ac   :  { %518 = vmatmul.mubr.bf16.vlgmr.msra.gmra.mrb[0].mxu0 %v393_v14 }
 0x37f   :  { %v519_v17 = vpop.f32.mrb[0].mxu0 }
 0x380   :  { %v520_v18 = vadd.f32 %v574_v16, %v519_v17  ;;  %v521_v19 = vpop.f32.mrb[1].mxu0 }
 0x381   :  { %v522_v20 = vpop.f32.mrb[2].mxu0 }
 0x382   :  { %v523_v21 = vpop.f32.mrb[3].mxu0  ;;  %526 = vrot.lane.b32.xlu1 %v520_v18, %s824_s5 }
 0x386   :  { %535 = vrot.lane.b32.xlu1 %v520_v18, %s825_s24 }
 0x3f4   :  { %v527_v22 = vpop.permute.xlu1 %526 }
 0x3f5   :  { %vm529_vm9 = vcmp.gt.f32.partialorder %v520_v18, %v527_v22 }
 0x3f6   :  { %v530_v23 = vsel %vm529_vm9, 1, %v821_v1 }
 0x3f7   :  { %532 = vperm.xlu0 %643, %v530_v23  }
 0x3f8   :  { %v536_v25 = vpop.permute.xlu1 %535 }
 0x476   :  { %v533_v24 = vpop.permute.xlu0 %532 }
 0x477   :  { %vm534_vm10 = vcmp.eq.s32.totalorder %v533_v24, 1 }
 0x478   :  { %v538_v26 = vsel %vm534_vm10, %v520_v18, %v536_v25 }
 0x479   :  { %540 = vrot.lane.b32.xlu1 %v538_v26, %s826_s25 }
 0x4eb   :  { %v541_v27 = vpop.permute.xlu1 %540 }
 0x4ec   :  { %v544_v28 = vsel %vm543_vm11, %v520_v18, %v541_v27 }
 0x4ed   :  { %v545_v29 = vsel %vm239_vm3, %v544_v28, 0.0 }
 0x4ee   :  { %546 = vst [vmem:[#allocation11] sm:$0x3] %v545_v29 }
 0x4ef   :  { %791 = shalt.err (!%p788_p2)
}
 0x4f0   :  { %s792_s30 = scalar_lea.hbm %s1023_s10, 32 }
 0x4f1   :  { %p793_p3 = scmp.ne.s32.totalorder %s1023_s10, %s792_s30  ;;  %p796_p4 = scmp.lt.u32.totalorder %s792_s30, %s1023_s10 }
 0x4f3   :  { %p798_p5 = pnand %p796_p4, %p793_p3 }
 0x4f5   :  { %801 = shalt.err (!%p798_p5)
}
 0x4f6   :  { %556 = dma.vmem_to_hbm [thread:$0]  %s554_s26, 32, %s1023_s10, [#allocation4]  }
 0x4f7   :  { %808 = dma.done.wait [#allocation4], 32  }
 0x4f8   :  { %809 = vsyncadd [#allocation4], 4294967264 }
 0x4f9   :  { %560 = vsyncpa [#allocation3], 1 }
 0x4fa   :  { %561 = vsyncpa [#allocation6], 1 }
 0x4fb   :  { %562 = vsyncpa [#allocation9], 1 }
 0x4fc   :  { %563 = vsyncpa [#allocation4], 1 }

// kernel: tpu_custom_call.1
= control target key start
LH: loop header
LB: loop body
LE: loop exit
PB: predicated region body
PF: predicated region fallthrough
CT: control target
= control target key end

     0   :  { %15 = vsyncpa [#allocation3], 0  ;;  %s1013_s0 = inlined_call_operand.hbm [shape: bf16[2,8,32], index: 0, kind: input, shape index: {}]   ;;  %s1014_s1 = inlined_call_operand.hbm [shape: f32[2,32], index: 1, kind: input, shape index: {}]   ;;  %s1015_s2 = inlined_call_operand.hbm [shape: bf16[2,4,8], index: 2, kind: input, shape index: {}]   ;;  %s1016_s3 = inlined_call_operand.vmem [shape: f32[2,4,1], index: 3, kind: input, shape index: {}]   ;;  %s1017_s4 = inlined_call_operand.vmem [shape: bf16[32,32], index: 4, kind: input, shape index: {}]   ;;  %s1018_s5 = inlined_call_operand.hbm [shape: f32[1,32], index: 5, kind: input, shape index: {}]   ;;  %s1019_s6 = inlined_call_operand.vmem [shape: bf16[32,32], index: 6, kind: input, shape index: {}]   ;;  %s1020_s7 = inlined_call_operand.vmem [shape: f32[1,32], index: 7, kind: input, shape index: {}]   ;;  %s1021_s8 = inlined_call_operand.hbm [shape: bf16[160,128], index: 8, kind: input, shape index: {}]   ;;  %s1022_s9 = inlined_call_operand.vmem [shape: f32[1,128], index: 9, kind: input, shape index: {}]   ;;  %s1023_s10 = inlined_call_operand.hbm [shape: f32[2,128], index: 10, kind: output, shape index: {}]  }
   0x1   :  { %16 = vsyncpa [#allocation6], 0 }
   0x2   :  { %17 = vsyncpa [#allocation9], 0 }
   0x3   :  { %18 = vsyncpa [#allocation4], 0  ;;  %s810_s13 = smov [#allocation5]   ;;  %s811_s15 = smov [#allocation8]  }
   0x4   :  { %s37_s14 = sshll.u32 %s810_s13, 4  ;;  %s63_s16 = sshll.u32 %s811_s15, 4  ;;  %s38_s14 = int_to_ptr.vmem [resolvable:$true] %s37_s14  ;;  %s64_s16 = int_to_ptr.vmem [resolvable:$true] %s63_s16 }
   0x5   :  { %s670_s19 = scalar_lea.hbm %s1014_s1, 32 }
   0x6   :  { %p671_p0 = scmp.ne.s32.totalorder %s1014_s1, %s670_s19  ;;  %p674_p1 = scmp.lt.u32.totalorder %s670_s19, %s1014_s1 }
   0x8   :  { %p676_p2 = pnand %p674_p1, %p671_p0 }
   0xa   :  { %679 = shalt.err (!%p676_p2)
}
   0xb   :  { %s680_s24 = scalar_lea.vmem %s38_s14, 32  ;;  %p685_p4 = scmp.lt.s32.totalorder %s38_s14, %s38_s14 }
   0xc   :  { %p681_p3 = scmp.ne.s32.totalorder %s38_s14, %s680_s24  ;;  %p686_p5 = scmp.lt.s32.totalorder %s680_s24, %s680_s24 }
   0xe   :  { %p687_p6 = por %p686_p5, %p685_p4 }
  0x10   :  { %p688_p7 = pnand %p687_p6, %p681_p3 }
  0x12   :  { %691 = shalt.err (!%p688_p7)
}
  0x13   :  { %40 = dma.hbm_to_vmem [thread:$0]  %s1014_s1, 32, %s38_s14, [#allocation6]  }
  0x14   :  { %s692_s29 = scalar_lea.hbm %s1018_s5, 16 }
  0x15   :  { %p693_p8 = scmp.ne.s32.totalorder %s1018_s5, %s692_s29  ;;  %p696_p9 = scmp.lt.u32.totalorder %s692_s29, %s1018_s5 }
  0x17   :  { %p698_p10 = pnand %p696_p9, %p693_p8 }
  0x19   :  { %701 = shalt.err (!%p698_p10)
}
  0x1a   :  { %s702_s15 = scalar_lea.vmem %s64_s16, 16  ;;  %s706_s17 = scalar_lea.vmem %s64_s16, 32 }
  0x1b   :  { %p703_p11 = scmp.ne.s32.totalorder %s64_s16, %s702_s15  ;;  %p707_p12 = scmp.lt.s32.totalorder %s64_s16, %s64_s16 }
  0x1c   :  { %p708_p13 = scmp.lt.s32.totalorder %s706_s17, %s702_s15 }
  0x1e   :  { %p709_p0 = por %p708_p13, %p707_p12 }
  0x20   :  { %p710_p1 = pnand %p709_p0, %p703_p11 }
  0x22   :  { %713 = shalt.err (!%p710_p1)
}
  0x23   :  { %66 = dma.hbm_to_vmem [thread:$0]  %s1018_s5, 16, %s64_s16, [#allocation9]  }
  0x24   :  { %s812_s18 = smov [#allocation2]   ;;  %s714_s22 = scalar_lea.hbm %s1013_s0, 128 }
  0x25   :  { %s24_s19 = sshll.u32 %s812_s18, 4  ;;  %p715_p2 = scmp.ne.s32.totalorder %s1013_s0, %s714_s22  ;;  %s25_s19 = int_to_ptr.vmem [resolvable:$true] %s24_s19 }
  0x26   :  { %p718_p3 = scmp.lt.u32.totalorder %s714_s22, %s1013_s0 }
  0x28   :  { %p720_p4 = pnand %p718_p3, %p715_p2 }
  0x2a   :  { %723 = shalt.err (!%p720_p4)
}
  0x2b   :  { %s724_s27 = scalar_lea.vmem %s25_s19, 128  ;;  %p729_p6 = scmp.lt.s32.totalorder %s25_s19, %s25_s19 }
  0x2c   :  { %p725_p5 = scmp.ne.s32.totalorder %s25_s19, %s724_s27  ;;  %p730_p7 = scmp.lt.s32.totalorder %s724_s27, %s724_s27 }
  0x2e   :  { %p731_p8 = por %p730_p7, %p729_p6 }
  0x30   :  { %p732_p9 = pnand %p731_p8, %p725_p5 }
  0x32   :  { %735 = shalt.err (!%p732_p9)
}
  0x33   :  { %s813_s5 = smov 64   ;;  %s814_s16 = smov 4  }
  0x34   :  { %30 = dma.hbm_to_vmem [thread:$0]  %s1013_s0, 128, %s25_s19, [#allocation3], %s813_s5, %s813_s5, %s814_s16  }
  0x35   :  { %s815_s30 = smov [#allocation7]   ;;  %s736_s15 = scalar_lea.hbm %s1015_s2, 64 }
  0x36   :  { %s46_s11 = sshll.u32 %s815_s30, 4  ;;  %p737_p10 = scmp.ne.s32.totalorder %s1015_s2, %s736_s15  ;;  %s47_s11 = int_to_ptr.vmem [resolvable:$true] %s46_s11 }
  0x37   :  { %p740_p11 = scmp.lt.u32.totalorder %s736_s15, %s1015_s2 }
  0x39   :  { %p742_p12 = pnand %p740_p11, %p737_p10 }
  0x3b   :  { %745 = shalt.err (!%p742_p12)
}
  0x3c   :  { %s746_s20 = scalar_lea.vmem %s47_s11, 64  ;;  %p751_p0 = scmp.lt.s32.totalorder %s47_s11, %s47_s11 }
  0x3d   :  { %p747_p13 = scmp.ne.s32.totalorder %s47_s11, %s746_s20  ;;  %p752_p1 = scmp.lt.s32.totalorder %s746_s20, %s746_s20 }
  0x3f   :  { %p753_p2 = por %p752_p1, %p751_p0 }
  0x41   :  { %p754_p3 = pnand %p753_p2, %p747_p13 }
  0x43   :  { %757 = shalt.err (!%p754_p3)
}
  0x44   :  { %s816_s0 = smov 32   ;;  %s817_s19 = smov 2  }
  0x45   :  { %52 = dma.hbm_to_vmem [thread:$0]  %s1015_s2, 64, %s47_s11, [#allocation6], %s816_s0, %s816_s0, %s817_s19  }
  0x46   :  { %s818_s23 = smov [#allocation10]   ;;  %s758_s27 = scalar_lea.hbm %s1021_s8, 1280 }
  0x47   :  { %s76_s24 = sshll.u32 %s818_s23, 4  ;;  %p759_p4 = scmp.ne.s32.totalorder %s1021_s8, %s758_s27  ;;  %s77_s24 = int_to_ptr.vmem [resolvable:$true] %s76_s24 }
  0x48   :  { %p762_p5 = scmp.lt.u32.totalorder %s758_s27, %s1021_s8 }
  0x4a   :  { %p764_p6 = pnand %p762_p5, %p759_p4 }
  0x4c   :  { %767 = shalt.err (!%p764_p6)
}
  0x4d   :  { %s768_s13 = scalar_lea.vmem %s77_s24, 1280  ;;  %p773_p8 = scmp.lt.s32.totalorder %s77_s24, %s77_s24 }
  0x4e   :  { %p769_p7 = scmp.ne.s32.totalorder %s77_s24, %s768_s13  ;;  %p774_p9 = scmp.lt.s32.totalorder %s768_s13, %s768_s13 }
  0x50   :  { %p775_p10 = por %p774_p9, %p773_p8 }
  0x52   :  { %p776_p11 = pnand %p775_p10, %p769_p7 }
  0x54   :  { %779 = shalt.err (!%p776_p11)
}
  0x55   :  { %82 = dma.hbm_to_vmem [thread:$0]  %s1021_s8, 1280, %s77_s24, [#allocation9], %s813_s5, %s813_s5, %s814_s16  }
  0x56   :  { %802 = dma.done.wait [#allocation3], 128  }
  0x57   :  { %803 = vsyncadd [#allocation3], 4294967168 }
  0x58   :  { %804 = dma.done.wait [#allocation6], 96  }
  0x59   :  { %805 = vsyncadd [#allocation6], 4294967200 }
  0x5a   :  { %806 = dma.done.wait [#allocation9], 1296  }
  0x5b   :  { %807 = vsyncadd [#allocation9], 4294966000  ;;  %v819_v0 = vmov 0.0   ;;  %vm820_vm0 = vmmov 0   ;;  %v821_v1 = vmov 0   ;;  %vm109_vm1 = vcmask 1043456  }
  0x5c   :  { %596 = vmatprep.subr.bf16.mxu1 %v819_v0  ;;  %598 = vmatprep.mubr.msk.bf16.mxu1 %vm820_vm0, %v819_v0  ;;  %v101_v2 = vld [vmem:[#allocation2] sm:$0xf]  ;;  %v102_v3 = vld [vmem:[#allocation2 + $0x4] sm:$0xf]  ;;  %vm105_vm2 = vcmask 64512   ;;  %v645_v12 = vld [vmem:[%s1017_s4 + $0x8] sm:$0xff]  }
  0x5d   :  { %642 = vset.pattern.permute.xlu0 %v821_v1  ;;  %485 = vmatprep.subr.bf16.mxu0 %v821_v1  ;;  %v111_v4 = vsel %vm109_vm1, %v101_v2, 0  ;;  %v157_v5 = vsel %vm109_vm1, %v102_v3, 0  ;;  %v103_v6 = vld [vmem:[#allocation7] sm:$0x3]  ;;  %v199_v7 = vld [vmem:[%s1016_s3] sm:$0xf] }
  0x5e   :  { %597 = vmatpush3.bf16.msra.mxu1 %v111_v4  ;;  %203 = vperm.xlu0 %642, %v199_v7   ;;  %v200_v8 = vld [vmem:[%s1016_s3 + $0x4] sm:$0xf]  ;;  %v104_v9 = vld [vmem:[#allocation7 + $0x2] sm:$0x3]  ;;  %v213_v10 = vld [vmem:[#allocation5] sm:$0x3] }
  0x5f   :  { %602 = vmatprep.subr.bf16.mxu1 %v819_v0  ;;  %658 = vtanh.f32 %v213_v10  ;;  %v644_v11 = vld [vmem:[%s1017_s4] sm:$0xff]   ;;  %vm239_vm3 = vcmask 261120   ;;  %v647_v16 = vld [vmem:[%s1019_s6 + $0x8] sm:$0xff]   ;;  %vm291_vm4 = vcmask 1043459   ;;  %vm286_vm5 = vcmask 1041409   ;;  %s822_s4 = smov 96  }
  0x60   :  { %v646_v14 = vld [vmem:[%s1019_s6] sm:$0xff]   ;;  %vm294_vm6 = vcmask 1041408   ;;  %v648_v50 = vld [vmem:[#allocation10] sm:$0xff]   ;;  %v649_v51 = vld [vmem:[#allocation10 + $0x8] sm:$0xff]   ;;  %vm389_vm7 = vcmask 523264   ;;  %vm391_vm8 = vcmask 785408  }
  0x61   :  { %599 = vmatmul.mubr.msk.bf16.vlgmr.msra.gmra.mrb[0].mxu1 %vm105_vm2, %v103_v6  ;;  %486 = vmatpush1.bf16.msra.mxu0 %v648_v50  ;;  %v650_v52 = vld [vmem:[#allocation10 + $0x10] sm:$0xff]   ;;  %v651_v53 = vld [vmem:[#allocation10 + $0x18] sm:$0xff]   ;;  %v652_v54 = vld [vmem:[#allocation10 + $0x20] sm:$0xff]   ;;  %s825_s24 = smov 30   ;;  %s826_s25 = smov 98   ;;  %vm543_vm11 = vcmask 15360  }
  0x62   :  { %603 = vmatpush3.bf16.msra.mxu1 %v157_v5  ;;  %604 = vmatprep.mubr.msk.bf16.mxu1 %vm820_vm0, %v819_v0  ;;  %v653_v55 = vld [vmem:[#allocation10 + $0x28] sm:$0xff]   ;;  %v654_v56 = vld [vmem:[#allocation10 + $0x30] sm:$0xff]   ;;  %v655_v57 = vld [vmem:[#allocation10 + $0x38] sm:$0xff]  }
  0x63   :  { %208 = vperm.xlu0 %642, %v200_v8   ;;  %608 = vmatprep.subr.bf16.mxu1 %v819_v0  ;;  %v570_v58 = vld [vmem:[%s1020_s7] ss:$0 sm:$0xff]  ;;  %v656_v60 = vld [vmem:[#allocation10 + $0x40] sm:$0xff]   ;;  %v657_v2 = vld [vmem:[#allocation10 + $0x48] sm:$0xff]  }
  0x64   :  { %487 = vmatprep.subr.bf16.mxu0 %v821_v1  ;;  %v566_v5 = vld [vmem:[#allocation8] ss:$0 sm:$0xff] }
  0x65   :  { %488 = vmatpush1.bf16.msra.mxu0 %v649_v51 }
  0x66   :  { %489 = vmatprep.subr.bf16.mxu0 %v821_v1 }
  0x69   :  { %605 = vmatmul.mubr.msk.bf16.vlgmr.msra.gmra.mrb[4].mxu1 %vm105_vm2, %v104_v9  ;;  %v659_v13 = vpop.eup %658  ;;  %490 = vmatpush1.bf16.msra.mxu0 %v650_v52 }
  0x6a   :  { %612 = vmatprep.mubr.msk.bf16.mxu1 %vm820_vm0, %v819_v0  ;;  %609 = vmatpush3.bf16.msra.mxu1 %v644_v11  ;;  %v215_v15 = vpack.c.bf16 %v659_v13, %v659_v13 }
  0x6b   :  { %610 = vmatprep.subr.bf16.mxu1 %v819_v0  ;;  %491 = vmatprep.subr.bf16.mxu0 %v821_v1 }
  0x6d   :  { %492 = vmatpush1.bf16.msra.mxu0 %v651_v53 }
  0x6e   :  { %611 = vmatpush3.bf16.msra.mxu1 %v645_v12  ;;  %493 = vmatprep.subr.bf16.mxu0 %v821_v1 }
  0x6f   :  { %616 = vmatprep.subr.bf16.mxu1 %v819_v0 }
  0x71   :  { %613 = vmatmul.mubr.msk.bf16.vlgmr.msra.gmra.mrb[8].mxu1 %vm239_vm3, %v215_v15  ;;  %494 = vmatpush1.bf16.msra.mxu0 %v652_v54  ;;  %v823_v15 = vmov 1  }
  0x72   :  { %617 = vmatpush3.bf16.msra.mxu1 %v646_v14  ;;  %620 = vmatprep.mubr.msk.bf16.mxu1 %vm820_vm0, %v819_v0 }
  0x73   :  { %618 = vmatprep.subr.bf16.mxu1 %v819_v0  ;;  %495 = vmatprep.subr.bf16.mxu0 %v821_v1 }
  0x74   :  { %643 = vset.pattern.permute.xlu0 %v823_v15 }
  0x75   :  { %496 = vmatpush1.bf16.msra.mxu0 %v653_v55 }
  0x76   :  { %619 = vmatpush3.bf16.msra.mxu1 %v647_v16  ;;  %497 = vmatprep.subr.bf16.mxu0 %v821_v1  ;;  %v574_v16 = vld [vmem:[%s1022_s9] ss:$0 sm:$0xff]  ;;  %s827_s9 = smov [#allocation11]  }
  0x77   :  { %s553_s26 = sshll.u32 %s827_s9, 4  ;;  %s554_s26 = int_to_ptr.vmem [resolvable:$true] %s553_s26 }
  0x78   :  { %s780_s27 = scalar_lea.vmem %s554_s26, 32  ;;  %p785_p13 = scmp.lt.s32.totalorder %s554_s26, %s554_s26 }
  0x79   :  { %498 = vmatpush1.bf16.msra.mxu0 %v654_v56  ;;  %p781_p12 = scmp.ne.s32.totalorder %s554_s26, %s780_s27  ;;  %p786_p0 = scmp.lt.s32.totalorder %s780_s27, %s780_s27 }
  0x7a   :  { %499 = vmatprep.subr.bf16.mxu0 %v821_v1 }
  0x7b   :  { %p787_p1 = por %p786_p0, %p785_p13 }
  0x7d   :  { %500 = vmatpush1.bf16.msra.mxu0 %v655_v57  ;;  %p788_p2 = pnand %p787_p1, %p781_p12 }
  0x7e   :  { %501 = vmatprep.subr.bf16.mxu0 %v821_v1 }
  0x81   :  { %502 = vmatpush1.bf16.msra.mxu0 %v656_v60 }
  0x82   :  { %503 = vmatprep.subr.bf16.mxu0 %v821_v1 }
  0x85   :  { %504 = vmatpush1.bf16.msra.mxu0 %v657_v2 }
  0xdd   :  { %v204_v19 = vpop.permute.xlu0 %203 }
  0xe2   :  { %v209_v23 = vpop.permute.xlu0 %208 }
 0x134   :  { %v147_v17 = vpop.f32.mrb[0].mxu1 }
 0x135   :  { %v600_v18 = vpop.f32.mrb[1].mxu1  ;;  %v211_v22 = vmul.f32 %v204_v19, %v147_v17 }
 0x136   :  { %v150_v20 = vpop.f32.mrb[2].mxu1 }
 0x137   :  { %v601_v21 = vpop.f32.mrb[3].mxu1  ;;  %660 = vtanh.f32 %v211_v22  ;;  %v289_v28 = vrot.slane %v211_v22, 7 }
 0x13c   :  { %v193_v24 = vpop.f32.mrb[4].mxu1 }
 0x13d   :  { %v212_v25 = vmul.f32 %v209_v23, %v193_v24  ;;  %v606_v26 = vpop.f32.mrb[5].mxu1 }
 0x13e   :  { %v196_v27 = vpop.f32.mrb[6].mxu1 }
 0x13f   :  { %v285_v29 = vrot.slane %v212_v25, 7  ;;  %v290_v30 = vrot.slane %v212_v25, 6  ;;  %662 = vtanh.f32 %v212_v25  ;;  %v607_v31 = vpop.f32.mrb[7].mxu1 }
 0x141   :  { %v292_v32 = vsel %vm291_vm4, %v290_v30, %v289_v28  ;;  %v287_v33 = vsel %vm286_vm5, %v285_v29, %v211_v22  ;;  %v661_v35 = vpop.eup %660 }
 0x142   :  { %v295_v34 = vsel %vm294_vm6, %v287_v33, %v292_v32  ;;  %v378_v37 = vrot.slane %v661_v35, 2  ;;  %v384_v39 = vrot.slane %v661_v35, 3 }
 0x143   :  { %664 = vtanh.f32 %v295_v34 }
 0x144   :  { %v277_v46 = vpop.f32.mrb[8].mxu1 }
 0x145   :  { %v614_v47 = vpop.f32.mrb[9].mxu1  ;;  %v278_v6 = vadd.f32 %v566_v5, %v277_v46 }
 0x146   :  { %v280_v48 = vpop.f32.mrb[10].mxu1 }
 0x147   :  { %v615_v49 = vpop.f32.mrb[11].mxu1 }
 0x149   :  { %v663_v36 = vpop.eup %662 }
 0x14a   :  { %v379_v38 = vrot.slane %v663_v36, 1  ;;  %v385_v40 = vrot.slane %v663_v36, 2 }
 0x14c   :  { %v380_v41 = vsel %vm286_vm5, %v379_v38, %v378_v37  ;;  %v386_v42 = vsel %vm286_vm5, %v385_v40, %v384_v39 }
 0x14d   :  { %v665_v43 = vpop.eup %664  ;;  %381 = vrot.lane.b32.xlu0 %v380_v41, %s822_s4  ;;  %v394_v44 = vpack.c.bf16 %v386_v42, %v386_v42 }
 0x14e   :  { %v297_v45 = vpack.c.bf16 %v665_v43, %v665_v43 }
 0x14f   :  { %585 = vmatprep.mubr.msk.bf16.mxu0 %vm239_vm3, %v394_v44 }
 0x150   :  { %621 = vmatmul.mubr.msk.bf16.vlgmr.msra.gmra.mrb[12].mxu1 %vm239_vm3, %v297_v45 }
 0x1bf   :  { %v382_v11 = vpop.permute.xlu0 %381 }
 0x223   :  { %v358_v59 = vpop.f32.mrb[12].mxu1 }
 0x224   :  { %v359_v61 = vadd.f32 %v570_v58, %v358_v59  ;;  %v622_v62 = vpop.f32.mrb[13].mxu1 }
 0x225   :  { %v361_v63 = vpop.f32.mrb[14].mxu1 }
 0x226   :  { %666 = vtanh.f32 %v359_v61  ;;  %v623_v0 = vpop.f32.mrb[15].mxu1 }
 0x227   :  { %668 = vtanh.f32 %v278_v6 }
 0x230   :  { %v667_v3 = vpop.eup %666 }
 0x231   :  { %369 = vrot.lane.b32.xlu1 %v667_v3, %s816_s0  ;;  %v372_v4 = vrot.slane %v667_v3, 2  ;;  %v669_v8 = vpop.eup %668 }
 0x235   :  { %373 = vrot.lane.b32.xlu1 %v372_v4, %s813_s5  ;;  %s824_s5 = smov 1  }
 0x2a3   :  { %v370_v7 = vpop.permute.xlu1 %369 }
 0x2a4   :  { %v388_v9 = vsel %vm239_vm3, %v669_v8, %v370_v7 }
 0x2a7   :  { %v374_v10 = vpop.permute.xlu1 %373 }
 0x2a8   :  { %v390_v12 = vsel %vm389_vm7, %v388_v9, %v374_v10 }
 0x2a9   :  { %v392_v13 = vsel %vm391_vm8, %v390_v12, %v382_v11 }
 0x2aa   :  { %v393_v14 = vpack.c.bf16 %v392_v13, %v392_v13 }
 0x2ac   :  { %518 = vmatmul.mubr.bf16.vlgmr.msra.gmra.mrb[0].mxu0 %v393_v14 }
 0x37f   :  { %v519_v17 = vpop.f32.mrb[0].mxu0 }
 0x380   :  { %v520_v18 = vadd.f32 %v574_v16, %v519_v17  ;;  %v521_v19 = vpop.f32.mrb[1].mxu0 }
 0x381   :  { %v522_v20 = vpop.f32.mrb[2].mxu0 }
 0x382   :  { %v523_v21 = vpop.f32.mrb[3].mxu0  ;;  %526 = vrot.lane.b32.xlu1 %v520_v18, %s824_s5 }
 0x386   :  { %535 = vrot.lane.b32.xlu1 %v520_v18, %s825_s24 }
 0x3f4   :  { %v527_v22 = vpop.permute.xlu1 %526 }
 0x3f5   :  { %vm529_vm9 = vcmp.gt.f32.partialorder %v520_v18, %v527_v22 }
 0x3f6   :  { %v530_v23 = vsel %vm529_vm9, 1, %v821_v1 }
 0x3f7   :  { %532 = vperm.xlu0 %643, %v530_v23  }
 0x3f8   :  { %v536_v25 = vpop.permute.xlu1 %535 }
 0x476   :  { %v533_v24 = vpop.permute.xlu0 %532 }
 0x477   :  { %vm534_vm10 = vcmp.eq.s32.totalorder %v533_v24, 1 }
 0x478   :  { %v538_v26 = vsel %vm534_vm10, %v520_v18, %v536_v25 }
 0x479   :  { %540 = vrot.lane.b32.xlu1 %v538_v26, %s826_s25 }
 0x4eb   :  { %v541_v27 = vpop.permute.xlu1 %540 }
 0x4ec   :  { %v544_v28 = vsel %vm543_vm11, %v520_v18, %v541_v27 }
 0x4ed   :  { %v545_v29 = vsel %vm239_vm3, %v544_v28, 0.0 }
 0x4ee   :  { %546 = vst [vmem:[#allocation11] sm:$0x3] %v545_v29 }
 0x4ef   :  { %791 = shalt.err (!%p788_p2)
}
 0x4f0   :  { %s792_s30 = scalar_lea.hbm %s1023_s10, 32 }
 0x4f1   :  { %p793_p3 = scmp.ne.s32.totalorder %s1023_s10, %s792_s30  ;;  %p796_p4 = scmp.lt.u32.totalorder %s792_s30, %s1023_s10 }
 0x4f3   :  { %p798_p5 = pnand %p796_p4, %p793_p3 }
 0x4f5   :  { %801 = shalt.err (!%p798_p5)
}
 0x4f6   :  { %556 = dma.vmem_to_hbm [thread:$0]  %s554_s26, 32, %s1023_s10, [#allocation4]  }
 0x4f7   :  { %808 = dma.done.wait [#allocation4], 32  }
 0x4f8   :  { %809 = vsyncadd [#allocation4], 4294967264 }
 0x4f9   :  { %560 = vsyncpa [#allocation3], 1 }
 0x4fa   :  { %561 = vsyncpa [#allocation6], 1 }
 0x4fb   :  { %562 = vsyncpa [#allocation9], 1 }
 0x4fc   :  { %563 = vsyncpa [#allocation4], 1 }

</bundles_post_ra>
